<compile_context>
chip_gen: v5e
topology: v5e:2x2
jax: 0.10.0
libtpu: 0.0.40
codegen_flags: <defaults>
</compile_context>

<pallas_src>
import jax
import jax.numpy as jnp
from jax.experimental import pallas as pl
from jax.experimental.pallas import tpu as pltpu

_LANE = 128
_MIN_SPLIT_BYTES = 1 * 1024 * 1024  # don't split tiny arrays across TCs


def _pos_add_kernel(x_ref, pos_ref, o_ref):
    # x_ref: (TB, TN), pos_ref: (1, TN) shared row, o_ref: (TB, TN).
    # Pure elementwise add; the (1, TN) row sublane-broadcasts over TB rows.
    o_ref[...] = x_ref[...] + pos_ref[...]


def _tpu_defaults():
    """Return (target_block_bytes, vmem_limit_bytes, split_for_two_cores)."""
    target, limit, split = 4 * 1024 * 1024, 32 * 1024 * 1024, False
    try:
        vmem = pltpu.get_tpu_info().vmem_capacity_bytes
    except Exception:
        return target, limit, split  # interpret mode / query unavailable
    if vmem is not None and vmem <= 80 * 1024 * 1024:
        # v7x-class: 64 MiB VMEM per TC, fast HBM, 2 TensorCores per chip.
        # (Worst case 2x(x)+2x(out)+2x(pos) blocks = 6 x 8 MiB = 48 MiB.)
        target, limit, split = 8 * 1024 * 1024, 48 * 1024 * 1024, True
    return target, limit, split


def _choose_tiles(num_rows, num_lanes, itemsize, target_bytes, sublane,
                  want_two_blocks):
    """Pick a (TB, TN) x-block: lanes a multiple of 128 (or the full extent),
    rows a multiple of `sublane` (or the full extent), never exceeding
    `target_bytes` (beyond the 8x128 hardware minimum)."""
    row_bytes = num_lanes * itemsize
    total = num_rows * row_bytes

    if total <= target_bytes:
        tb, tn = num_rows, num_lanes
        # v7x: guarantee >=2 blocks along a "parallel" axis so the grid can
        # shard across both TensorCores (skip for tiny arrays).
        if want_two_blocks and total >= _MIN_SPLIT_BYTES:
            if num_rows >= 2 * sublane:
                tb = max(sublane, ((num_rows // 2) // sublane) * sublane)
            elif num_lanes >= 2 * _LANE:
                tn = max(_LANE, ((num_lanes // 2) // _LANE) * _LANE)
        return tb, tn

    if row_bytes <= target_bytes:
        # Keep the full (lane-dense) row; tile over rows.
        tb = min(num_rows, max(1, target_bytes // row_bytes))
        if tb < num_rows:
            tb = max(sublane, (tb // sublane) * sublane)
            tb = min(tb, num_rows)
        tn = num_lanes
        if tb * row_bytes > target_bytes:
            # Clamping tb up to the sublane minimum overshot the budget:
            # shrink the lane tile so the block stays within target.
            tn = max(_LANE, ((target_bytes // (tb * itemsize)) // _LANE) * _LANE)
            tn = min(tn, num_lanes)
        return tb, tn

    # A single flattened row is larger than the target: tile lanes as well.
    tb = min(num_rows, sublane)
    tn = max(_LANE, ((target_bytes // (tb * itemsize)) // _LANE) * _LANE)
    tn = min(tn, num_lanes)
    return tb, tn


def positional_encoder_forward(x, pos):
    """x: (B, L, D); pos: (max_seq_length, d_model). Returns x + pos[:, :L]."""
    assert x.ndim == 3, "PositionalEncoder kernel expects X of shape (B, L, D)"
    B, L, D = x.shape

    # Glue: the exact pos[:, :X.size(1)] slice from the PyTorch forward.
    pos_slice = pos[:, :L]

    # Static check that the original module's broadcast is valid and does not
    # change X's shape (raises at trace time otherwise).
    out_shape = jnp.broadcast_shapes(x.shape, pos_slice.shape)
    assert out_shape == x.shape, (
        "PositionalEncoder broadcast is incompatible with X: "
        f"broadcast shape {out_shape} != X shape {x.shape}")

    # Follow NumPy/PyTorch type promotion for `X + pos` (e.g. bf16 + f32 -> f32)
    # instead of silently downcasting the pos parameter to x.dtype.
    out_dtype = jnp.result_type(x.dtype, pos.dtype)

    # Lane-dense 2D views: rows = batch, lanes = L*D (unmasked vector stores).
    N = L * D
    x2 = x.astype(out_dtype).reshape(B, N)
    pos2 = jnp.broadcast_to(pos_slice, (L, D)).astype(out_dtype).reshape(1, N)

    itemsize = jnp.dtype(out_dtype).itemsize
    sublane = max(8, 32 // itemsize)  # 8 rows f32, 16 bf16, 32 int8/fp8
    target_bytes, vmem_limit, split_two = _tpu_defaults()
    tb, tn = _choose_tiles(B, N, itemsize, target_bytes, sublane, split_two)

    # Grid order (lane-blocks, row-blocks): the inner axis walks rows, so pos's
    # block index (0, j) is unchanged between consecutive steps and its DMA is
    # only issued once per lane block.
    grid = (pl.cdiv(N, tn), pl.cdiv(B, tb))

    out2 = pl.pallas_call(
        _pos_add_kernel,
        out_shape=jax.ShapeDtypeStruct((B, N), out_dtype),
        grid_spec=pltpu.PrefetchScalarGridSpec(
            num_scalar_prefetch=0,
            grid=grid,
            in_specs=[
                pl.BlockSpec((tb, tn), lambda j, i: (i, j)),
                # pos: single shared row, invariant across the row-grid axis.
                pl.BlockSpec((1, tn), lambda j, i: (0, j)),
            ],
            out_specs=pl.BlockSpec((tb, tn), lambda j, i: (i, j)),
        ),
        compiler_params=pltpu.CompilerParams(
            dimension_semantics=("parallel", "parallel"),
            vmem_limit_bytes=vmem_limit,
        ),
        # Output reuses x's (cast/reshaped) buffer: no extra B*L*D allocation.
        input_output_aliases={0: 0},
    )(x2, pos2)
    return out2.reshape(B, L, D)


if __name__ == "__main__":
    # Small shapes consistent with the module's broadcast requirements:
    #   d_model = 32, max_seq_length = 16, X: (B=2, L=16, D=16)
    d_model = 32
    max_seq_length = 16
    B, L, D = 2, 16, 16

    key = jax.random.PRNGKey(0)
    k_pos, k_x = jax.random.split(key)
    # Deterministic "parameter" init (torch.randn equivalent).
    pos = jax.random.normal(k_pos, (max_seq_length, d_model), dtype=jnp.float32)
    x = jax.random.normal(k_x, (B, L, D), dtype=jnp.float32)

    fwd = jax.jit(positional_encoder_forward)
    out = fwd(x, pos)
    out = jax.block_until_ready(out)

    # Pure-JAX reference check of the exact PyTorch semantics.
    ref = x + pos[:, :x.shape[1]]
    assert out.shape == ref.shape and out.dtype == ref.dtype
    assert jnp.allclose(out, ref, atol=1e-6, rtol=1e-6)

    print("KERNEL_OK")
</pallas_src>

<mosaic_0001>
module attributes {stable_mosaic.version = 11 : i64} {
  func.func @_pos_add_kernel(%arg0: i32, %arg1: i32, %arg2: memref<2x256xf32, #tpu.memory_space<vmem>>, %arg3: memref<1x256xf32, #tpu.memory_space<vmem>>, %arg4: memref<2x256xf32, #tpu.memory_space<vmem>>) attributes {dimension_semantics = [#tpu.dimension_semantics<parallel>, #tpu.dimension_semantics<parallel>], iteration_bounds = array<i64: 1, 1>, scalar_prefetch = 0 : i64, scratch_operands = 0 : i64, tpu.core_type = #tpu.core_type<tc>, window_params = [{transform_indices = @transform_0, window_bounds = array<i64: 2, 256>}, {transform_indices = @transform_1, window_bounds = array<i64: 1, 256>}, {transform_indices = @transform_2, window_bounds = array<i64: 2, 256>}]} {
    %c0 = arith.constant 0 : index
    %c0_0 = arith.constant 0 : index
    %0 = vector.load %arg2[%c0, %c0_0] : memref<2x256xf32, #tpu.memory_space<vmem>>, vector<2x256xf32>
    %c0_1 = arith.constant 0 : index
    %c0_2 = arith.constant 0 : index
    %1 = vector.load %arg3[%c0_1, %c0_2] : memref<1x256xf32, #tpu.memory_space<vmem>>, vector<1x256xf32>
    %2 = vector.broadcast %1 : vector<1x256xf32> to vector<2x256xf32>
    %3 = arith.addf %0, %2 : vector<2x256xf32>
    %c0_3 = arith.constant 0 : index
    %c0_4 = arith.constant 0 : index
    %4 = vector.load %arg4[%c0_3, %c0_4] : memref<2x256xf32, #tpu.memory_space<vmem>>, vector<2x256xf32>
    tpu.vector_store %arg4[%c0_3, %c0_4], %3 {strides = array<i32>} : memref<2x256xf32, #tpu.memory_space<vmem>>, vector<2x256xf32>,
    return
  }
  func.func @transform_0(%arg0: i32, %arg1: i32) -> (i32, i32) {
    %c0_i32 = arith.constant 0 : i32
    return %arg1, %arg0 : i32, i32
  }
  func.func @transform_1(%arg0: i32, %arg1: i32) -> (i32, i32) {
    %c0_i32 = arith.constant 0 : i32
    %c0_i32_0 = arith.constant 0 : i32
    return %c0_i32, %arg0 : i32, i32
  }
  func.func @transform_2(%arg0: i32, %arg1: i32) -> (i32, i32) {
    %c0_i32 = arith.constant 0 : i32
    return %arg1, %arg0 : i32, i32
  }
}

</mosaic_0001>

<bundles_post_ra>
// kernel: positional_encoder_forward.1
= control target key start
LH: loop header
LB: loop body
LE: loop exit
PB: predicated region body
PF: predicated region fallthrough
CT: control target
= control target key end

     0   :  { %vm17_vm0 = vcmask 1041408   ;;  %s50_s1 = inlined_call_operand.vmem [shape: f32[1,256], index: 1, kind: input, shape index: {}]   ;;  %s51_s0 = inlined_call_operand.vmem [shape: f32[2,256], index: 0, kind: input, shape index: {}, may-alias: {0,2}]   ;;  %s52_s2 = inlined_call_operand.vmem [shape: f32[2,256], index: 2, kind: output, shape index: {}, may-alias: {0,2}]  }
   0x1   :  { %v12_v0 = vld [vmem:[%s50_s1] sm:$0x3] }
   0x2   :  { %v14_v1 = vperm.slane %v12_v0, 0  ;;  %v15_v2 = vperm.slane %v12_v0, 1  ;;  %v11_v3 = vld [vmem:[%s51_s0] sm:$0xf] }
   0x4   :  { %v16_v4 = vrot.slane %v15_v2, 6 }
   0x6   :  { %v18_v5 = vsel %vm17_vm0, %v14_v1, %v16_v4 }
   0x7   :  { %v20_v6 = vadd.f32 %v18_v5, %v11_v3 }
   0x9   :  { %21 = vst [vmem:[%s52_s2] sm:$0xf] %v20_v6 }

</bundles_post_ra>
